<compile_context>
chip_gen: v7x
topology: tpu7x:2x2x1
jax: 0.10.0
libtpu: 0.0.40
codegen_flags: <defaults>
</compile_context>

<pallas_src>
import jax
import jax.numpy as jnp
from jax import lax
from jax.experimental import pallas as pl
from jax.experimental.pallas import tpu as pltpu


def _round_up(x, m):
    return ((x + m - 1) // m) * m


def _linear22_kernel(w_ref, b_ref, x_ref, y_ref):
    """Lane-interleaved Linear(2, 2).

    x_ref / y_ref : (ROWS, 128) VMEM slabs of the flattened (N, 2) batch.
                    Even lanes hold feature 0, odd lanes hold feature 1
                    (row-major flatten of (N, 2)); pairs never straddle rows.
    w_ref         : (2, 2) f32 in SMEM (row o = output feature o).
    b_ref         : (2,)   f32 in SMEM.
    """
    x = x_ref[...].astype(jnp.float32)
    n_lanes = x.shape[1]

    lane = lax.broadcasted_iota(jnp.int32, (1, n_lanes), 1)     # (1, 128)
    is_f0 = (lane & 1) == 0                                      # even lane -> feature 0

    # Partner lane value x[:, l ^ 1] via two cyclic lane-rolls.  We also roll
    # the lane index and select whichever roll actually sourced lane l ^ 1, so
    # the code does not depend on the roll direction convention.  Rolls use the
    # XLU slot, which has slack in this memory-bound kernel.
    r_a = pltpu.roll(x, shift=1, axis=1)
    r_b = pltpu.roll(x, shift=n_lanes - 1, axis=1)
    src_a = pltpu.roll(lane, shift=1, axis=1)
    partner = jnp.where(src_a == (lane ^ 1), r_a, r_b)

    # Even lanes: y0 = w00*x0 + w01*x1 + b0 ; odd lanes: y1 = w10*x0 + w11*x1 + b1
    w_self = jnp.where(is_f0, w_ref[0, 0], w_ref[1, 1])          # (1, 128)
    w_cross = jnp.where(is_f0, w_ref[0, 1], w_ref[1, 0])         # (1, 128)
    b_sel = jnp.where(is_f0, b_ref[0], b_ref[1])                 # (1, 128)

    y_ref[...] = (w_self * x + w_cross * partner + b_sel).astype(y_ref.dtype)


def fake_model_forward(x, weight, bias, *, block_rows=2048):
    """y = x @ weight.T + bias  (nn.Linear(2, 2) forward) for x of shape (N, 2)."""
    n, in_f = x.shape
    out_f = weight.shape[0]
    assert in_f == 2 and out_f == 2, "kernel is specialized for nn.Linear(2, 2)"

    # Clean 32-bit parameters for SMEM.
    w = weight.astype(jnp.float32)
    b = bias.astype(jnp.float32)

    lanes = 128
    slab_elems = 8 * lanes                      # one full (8, 128) f32 slab

    # Native interleaved layout: row-major flatten of (N, 2) puts feature 0 at
    # even flat indices and feature 1 at odd ones; reshaping the trailing axis
    # to (rows, 128) is free (no transpose, no HBM relayout pass).
    flat = x.reshape(-1)
    total = flat.shape[0]                       # 2 * N
    padded = _round_up(total, slab_elems)
    if padded != total:
        # TODO(synk): the tail pad costs one extra copy of x when 2N is not a
        # multiple of 1024; a manual-DMA ragged tail would avoid it, but it is
        # not worth the complexity for this 2-feature linear.
        flat = jnp.pad(flat, (0, padded - total))
    rows = padded // lanes                      # multiple of 8
    slab = flat.reshape(rows, lanes)

    # Block rows: multiple of 8 (guard unaligned caller values), capped at the
    # slab height.  Default 2048 rows -> 1 MiB f32 per tile, ~4 MiB pipelined
    # VMEM + a few MiB of temporaries: fits v5e/v6e/v7x with the limit below.
    rows_blk = max(8, (min(block_rows, rows) // 8) * 8)
    num_blocks = pl.cdiv(rows, rows_blk)        # ragged last block handled by Pallas

    y_slab = pl.pallas_call(
        _linear22_kernel,
        out_shape=jax.ShapeDtypeStruct((rows, lanes), x.dtype),
        grid=(num_blocks,),
        in_specs=[
            pl.BlockSpec(memory_space=pltpu.MemorySpace.SMEM),   # weight (2, 2), resident
            pl.BlockSpec(memory_space=pltpu.MemorySpace.SMEM),   # bias (2,), resident
            pl.BlockSpec((rows_blk, lanes), lambda i: (i, 0)),   # lane-dense batch slab
        ],
        out_specs=pl.BlockSpec((rows_blk, lanes), lambda i: (i, 0)),
        compiler_params=pltpu.CompilerParams(
            dimension_semantics=("parallel",),
            vmem_limit_bytes=32 * 1024 * 1024,
        ),
    )(w, b, slab)

    y = y_slab.reshape(-1)
    if padded != total:
        y = y[:total]
    return y.reshape(n, out_f)


if __name__ == "__main__":
    key = jax.random.PRNGKey(0)
    kx, kw, kb, kx2, kx3 = jax.random.split(key, 5)

    # Deterministic "parameters" for nn.Linear(2, 2): weight (2, 2), bias (2,)
    weight = jax.random.normal(kw, (2, 2), dtype=jnp.float32) * 0.5
    bias = jax.random.normal(kb, (2,), dtype=jnp.float32) * 0.1

    # Primary small example input (matches the module spec): batch of 8 rows.
    x = jax.random.normal(kx, (8, 2), dtype=jnp.float32)
    y = jax.block_until_ready(fake_model_forward(x, weight, bias))
    y_ref = x @ weight.T + bias
    assert y.shape == (8, 2)
    assert jnp.allclose(y, y_ref, atol=1e-5, rtol=1e-5)

    # Exercise the multi-step grid + ragged last block + pad path
    # (2*2600 = 5200 elems -> padded to 6144 -> 48 rows; block_rows=32 -> 2 steps).
    x2 = jax.random.normal(kx2, (2600, 2), dtype=jnp.float32)
    y2 = jax.block_until_ready(fake_model_forward(x2, weight, bias, block_rows=32))
    y2_ref = x2 @ weight.T + bias
    assert y2.shape == (2600, 2)
    assert jnp.allclose(y2, y2_ref, atol=1e-5, rtol=1e-5)

    # Exercise the pad-free fast path (2*512 = 1024 elems -> exactly 8 rows).
    x3 = jax.random.normal(kx3, (512, 2), dtype=jnp.float32)
    y3 = jax.block_until_ready(fake_model_forward(x3, weight, bias))
    y3_ref = x3 @ weight.T + bias
    assert y3.shape == (512, 2)
    assert jnp.allclose(y3, y3_ref, atol=1e-5, rtol=1e-5)

    print("KERNEL_OK")
</pallas_src>

<mosaic_0001>
module attributes {stable_mosaic.version = 11 : i64} {
  func.func @_linear22_kernel(%arg0: i32, %arg1: memref<2x2xf32, #tpu.memory_space<smem>>, %arg2: memref<2xf32, #tpu.memory_space<smem>>, %arg3: memref<8x128xf32, #tpu.memory_space<vmem>>, %arg4: memref<8x128xf32, #tpu.memory_space<vmem>>) attributes {dimension_semantics = [#tpu.dimension_semantics<parallel>], iteration_bounds = array<i64: 1>, scalar_prefetch = 0 : i64, scratch_operands = 0 : i64, tpu.core_type = #tpu.core_type<tc>, window_params = [{transform_indices = @transform_0, window_bounds = array<i64: 2, 2>}, {transform_indices = @transform_1, window_bounds = array<i64: 2>}, {transform_indices = @transform_2, window_bounds = array<i64: 8, 128>}, {transform_indices = @transform_3, window_bounds = array<i64: 8, 128>}]} {
    %c0 = arith.constant 0 : index
    %c0_0 = arith.constant 0 : index
    %0 = vector.load %arg3[%c0, %c0_0] : memref<8x128xf32, #tpu.memory_space<vmem>>, vector<8x128xf32>
    %1 = tpu.iota {dimensions = array<i32: 1>} : vector<1x128xi32>
    %c1_i32 = arith.constant 1 : i32
    %2 = vector.broadcast %c1_i32 : i32 to vector<1x128xi32>
    %3 = arith.andi %1, %2 : vector<1x128xi32>
    %c0_i32 = arith.constant 0 : i32
    %4 = vector.broadcast %c0_i32 : i32 to vector<1x128xi32>
    %5 = arith.cmpi eq, %3, %4 : vector<1x128xi32>
    %c1_i32_1 = arith.constant 1 : i32
    %6 = tpu.dynamic_rotate %0 by %c1_i32_1 dim 1 : vector<8x128xf32>, i32 -> vector<8x128xf32>
    %c127_i32 = arith.constant 127 : i32
    %7 = tpu.dynamic_rotate %0 by %c127_i32 dim 1 : vector<8x128xf32>, i32 -> vector<8x128xf32>
    %c1_i32_2 = arith.constant 1 : i32
    %8 = tpu.dynamic_rotate %1 by %c1_i32_2 dim 1 : vector<1x128xi32>, i32 -> vector<1x128xi32>
    %c1_i32_3 = arith.constant 1 : i32
    %9 = vector.broadcast %c1_i32_3 : i32 to vector<1x128xi32>
    %10 = arith.xori %1, %9 : vector<1x128xi32>
    %11 = arith.cmpi eq, %8, %10 : vector<1x128xi32>
    %12 = vector.shape_cast %11 : vector<1x128xi1> to vector<1x128xi1>
    %13 = vector.broadcast %12 : vector<1x128xi1> to vector<8x128xi1>
    %14 = arith.select %13, %6, %7 : vector<8x128xi1>, vector<8x128xf32>
    %c0_4 = arith.constant 0 : index
    %c0_5 = arith.constant 0 : index
    %15 = memref.load %arg1[%c0_4, %c0_5] : memref<2x2xf32, #tpu.memory_space<smem>>
    %c1 = arith.constant 1 : index
    %c1_6 = arith.constant 1 : index
    %16 = memref.load %arg1[%c1, %c1_6] : memref<2x2xf32, #tpu.memory_space<smem>>
    %17 = vector.broadcast %15 : f32 to vector<1x128xf32>
    %18 = vector.broadcast %16 : f32 to vector<1x128xf32>
    %19 = arith.select %5, %17, %18 : vector<1x128xi1>, vector<1x128xf32>
    %c0_7 = arith.constant 0 : index
    %c1_8 = arith.constant 1 : index
    %20 = memref.load %arg1[%c0_7, %c1_8] : memref<2x2xf32, #tpu.memory_space<smem>>
    %c1_9 = arith.constant 1 : index
    %c0_10 = arith.constant 0 : index
    %21 = memref.load %arg1[%c1_9, %c0_10] : memref<2x2xf32, #tpu.memory_space<smem>>
    %22 = vector.broadcast %20 : f32 to vector<1x128xf32>
    %23 = vector.broadcast %21 : f32 to vector<1x128xf32>
    %24 = arith.select %5, %22, %23 : vector<1x128xi1>, vector<1x128xf32>
    %c0_11 = arith.constant 0 : index
    %25 = memref.load %arg2[%c0_11] : memref<2xf32, #tpu.memory_space<smem>>
    %c1_12 = arith.constant 1 : index
    %26 = memref.load %arg2[%c1_12] : memref<2xf32, #tpu.memory_space<smem>>
    %27 = vector.broadcast %25 : f32 to vector<1x128xf32>
    %28 = vector.broadcast %26 : f32 to vector<1x128xf32>
    %29 = arith.select %5, %27, %28 : vector<1x128xi1>, vector<1x128xf32>
    %30 = vector.broadcast %19 : vector<1x128xf32> to vector<8x128xf32>
    %31 = arith.mulf %30, %0 : vector<8x128xf32>
    %32 = vector.broadcast %24 : vector<1x128xf32> to vector<8x128xf32>
    %33 = arith.mulf %32, %14 : vector<8x128xf32>
    %34 = arith.addf %31, %33 : vector<8x128xf32>
    %35 = vector.broadcast %29 : vector<1x128xf32> to vector<8x128xf32>
    %36 = arith.addf %34, %35 : vector<8x128xf32>
    %c0_13 = arith.constant 0 : index
    %c0_14 = arith.constant 0 : index
    %37 = vector.load %arg4[%c0_13, %c0_14] : memref<8x128xf32, #tpu.memory_space<vmem>>, vector<8x128xf32>
    tpu.vector_store %arg4[%c0_13, %c0_14], %36 {strides = array<i32>} : memref<8x128xf32, #tpu.memory_space<vmem>>, vector<8x128xf32>,
    return
  }
  func.func @transform_0(%arg0: i32) -> (i32, i32) {
    %c0_i32 = arith.constant 0 : i32
    %c0_i32_0 = arith.constant 0 : i32
    %c0_i32_1 = arith.constant 0 : i32
    return %c0_i32, %c0_i32_0 : i32, i32
  }
  func.func @transform_1(%arg0: i32) -> i32 {
    %c0_i32 = arith.constant 0 : i32
    %c0_i32_0 = arith.constant 0 : i32
    return %c0_i32 : i32
  }
  func.func @transform_2(%arg0: i32) -> (i32, i32) {
    %c0_i32 = arith.constant 0 : i32
    %c0_i32_0 = arith.constant 0 : i32
    return %arg0, %c0_i32 : i32, i32
  }
  func.func @transform_3(%arg0: i32) -> (i32, i32) {
    %c0_i32 = arith.constant 0 : i32
    %c0_i32_0 = arith.constant 0 : i32
    return %arg0, %c0_i32 : i32, i32
  }
}

</mosaic_0001>

<bundles_post_ra>
// kernel: tpu_custom_call.1
= control target key start
LH: loop header
LB: loop body
LE: loop exit
PB: predicated region body
PF: predicated region fallthrough
CT: control target
= control target key end

     0   :  { %8 = vsyncpa [#allocation5], 0  ;;  %s268_s0 = inlined_call_operand.hbm [shape: f32[2,2], index: 0, kind: input, shape index: {}]   ;;  %s269_s1 = inlined_call_operand.vmem [shape: f32[2], index: 1, kind: input, shape index: {}]   ;;  %s270_s2 = inlined_call_operand.hbm [shape: f32[8,128], index: 2, kind: input, shape index: {}]   ;;  %s271_s3 = inlined_call_operand.hbm [shape: f32[8,128], index: 3, kind: output, shape index: {}]  }
   0x1   :  { %9 = vsyncpa [#allocation6], 0 }
   0x2   :  { %10 = vsyncpa [#allocation3], 0 }
   0x3   :  { %11 = vsyncpa [#allocation4], 0  ;;  %s26_s14 = sshll.u32 %s269_s1, 4  ;;  %s118_s17 = scalar_lea.hbm %s268_s0, 32  ;;  %s27_s14 = int_to_ptr.vmem [resolvable:$true] %s26_s14 }
   0x4   :  { %p119_p0 = scmp.ne.s32.totalorder %s268_s0, %s118_s17  ;;  %p122_p1 = scmp.lt.u32.totalorder %s118_s17, %s268_s0 }
   0x6   :  { %p124_p2 = pnand %p122_p1, %p119_p0 }
   0x8   :  { %127 = shalt.err (!%p124_p2)
}
   0x9   :  { %s192_s22 = smov [#allocation2]   ;;  %s128_s1 = scalar_lea.vmem %s27_s14, 16 }
   0xa   :  { %19 = dma.hbm_to_smem %s268_s0, 32, %s192_s22, [#allocation5]  }
   0xb   :  { %p129_p3 = scmp.ne.s32.totalorder %s27_s14, %s128_s1  ;;  %p133_p4 = scmp.lt.s32.totalorder %s27_s14, %s27_s14 }
   0xc   :  { %p134_p5 = scmp.lt.s32.totalorder %s128_s1, %s128_s1 }
   0xe   :  { %p135_p6 = por %p134_p5, %p133_p4 }
  0x10   :  { %p136_p7 = pnand %p135_p6, %p129_p3 }
  0x12   :  { %139 = shalt.err (!%p136_p7)
}
  0x13   :  { %s193_s25 = smov [#allocation7]   ;;  %s194_s26 = smov [#allocation8]  }
  0x14   :  { %29 = dma.vmem_to_smem %s27_s14, 16, %s193_s25, [#allocation6]  }
  0x15   :  { %s36_s27 = sshll.u32 %s194_s26, 4  ;;  %s140_s30 = scalar_lea.hbm %s270_s2, 128  ;;  %s37_s27 = int_to_ptr.vmem [resolvable:$true] %s36_s27 }
  0x16   :  { %p141_p8 = scmp.ne.s32.totalorder %s270_s2, %s140_s30  ;;  %p144_p9 = scmp.lt.u32.totalorder %s140_s30, %s270_s2 }
  0x18   :  { %p146_p10 = pnand %p144_p9, %p141_p8 }
  0x1a   :  { %149 = shalt.err (!%p146_p10)
}
  0x1b   :  { %s150_s7 = scalar_lea.vmem %s37_s27, 128  ;;  %p155_p12 = scmp.lt.s32.totalorder %s37_s27, %s37_s27 }
  0x1c   :  { %p151_p11 = scmp.ne.s32.totalorder %s37_s27, %s150_s7  ;;  %p156_p13 = scmp.lt.s32.totalorder %s150_s7, %s150_s7 }
  0x1e   :  { %p157_p0 = por %p156_p13, %p155_p12 }
  0x20   :  { %p158_p1 = pnand %p157_p0, %p151_p11 }
  0x22   :  { %161 = shalt.err (!%p158_p1)
}
  0x23   :  { %39 = dma.hbm_to_vmem [thread:$0]  %s270_s2, 128, %s37_s27, [#allocation3]  }
  0x24   :  { %184 = dma.done.wait [#allocation5], 32  }
  0x25   :  { %185 = vsyncadd [#allocation5], 4294967264 }
  0x26   :  { %186 = dma.done.wait [#allocation6], 16  }
  0x27   :  { %187 = vsyncadd [#allocation6], 4294967280 }
  0x28   :  { %188 = dma.done.wait [#allocation3], 128  }
  0x29   :  { %189 = vsyncadd [#allocation3], 4294967168 }
  0x2a   :  { %49 = sfence }
  0x2b   :  { %v51_v0 = vlaneseq  ;;  %v50_v1 = vld [vmem:[#allocation8] sm:$0xff]  ;;  %s70_s10 = sld [smem:[#allocation2]]  ;;  %s107_s11 = sld [smem:[#allocation2 + $0x81]]  ;;  %v197_v15 = vmov 0  }
  0x2c   :  { %s195_s12 = smov 127   ;;  %s196_s13 = smov 1  }
  0x2d   :  { %57 = vrot.lane.b32.xlu1 %v50_v1, %s195_s12  ;;  %v52_v2 = vand.u32 127, %v51_v0  ;;  %s108_s2 = sld [smem:[#allocation2 + $0x1]]  ;;  %s109_s14 = sld [smem:[#allocation2 + $0x80]]  ;;  %v65_v9 = vshrl.u32 %v51_v0, 7 }
  0x2e   :  { %s80_s15 = sld [smem:[#allocation7]]  ;;  %s110_s16 = sld [smem:[#allocation7 + $0x1]] }
  0x2f   :  { %59 = vrot.lane.b32.xlu0 %v52_v2, %s196_s13  ;;  %v53_v3 = vand.u32 1, %v52_v2  ;;  %v61_v10 = vxor.u32 1, %v52_v2  ;;  %v66_v11 = vsub.s32 0, %v65_v9  ;;  %s198_s17 = smov [#allocation9]  }
  0x30   :  { %s96_s18 = sshll.u32 %s198_s17, 4  ;;  %s97_s18 = int_to_ptr.vmem [resolvable:$true] %s96_s18 }
  0x31   :  { %vm246_vm0 = vcmp.eq.s32.totalorder %v53_v3, 0  ;;  %v72_v5 = vstv %s70_s10  ;;  %v73_v6 = vstv %s107_s11  ;;  %s162_s19 = scalar_lea.vmem %s97_s18, 128  ;;  %p167_p3 = scmp.lt.s32.totalorder %s97_s18, %s97_s18 }
  0x32   :  { %v74_v7 = vsel %vm246_vm0, %v72_v5, %v73_v6  ;;  %p163_p2 = scmp.ne.s32.totalorder %s97_s18, %s162_s19  ;;  %p168_p4 = scmp.lt.s32.totalorder %s162_s19, %s162_s19 }
  0x33   :  { %55 = vrot.lane.b32.xlu0 %v50_v1, %s196_s13  ;;  %v85_v8 = vmul.f32 %v74_v7, %v50_v1  ;;  %v77_v13 = vstv %s108_s2  ;;  %v78_v14 = vstv %s109_s14 }
  0x34   :  { %v79_v19 = vsel %vm246_vm0, %v77_v13, %v78_v14  ;;  %v82_v21 = vstv %s80_s15  ;;  %v83_v22 = vstv %s110_s16  ;;  %p169_p5 = por %p168_p4, %p167_p3 }
  0x35   :  { %v84_v25 = vsel %vm246_vm0, %v82_v21, %v83_v22 }
  0x36   :  { %p170_p6 = pnand %p169_p5, %p163_p2 }
  0x9f   :  { %v58_v18 = vpop.permute.xlu1 %57 }
  0xa1   :  { %v60_v12 = vpop.permute.xlu0 %59 }
  0xa2   :  { %vm62_vm1 = vcmp.eq.s32.totalorder %v60_v12, %v61_v10 }
  0xa3   :  { %v63_v16 = vsel %vm62_vm1, 1, %v197_v15 }
  0xa4   :  { %v67_v17 = vrot.slane %v63_v16, %v66_v11 }
  0xa5   :  { %v56_v20 = vpop.permute.xlu0 %55 }
  0xa6   :  { %vm68_vm2 = vcmp.eq.s32.totalorder %v67_v17, 1 }
  0xa7   :  { %v69_v23 = vsel %vm68_vm2, %v56_v20, %v58_v18 }
  0xa8   :  { %v86_v24 = vmul.f32 %v79_v19, %v69_v23 }
  0xaa   :  { %v87_v26 = vadd.f32 %v86_v24, %v85_v8 }
  0xac   :  { %v88_v27 = vadd.f32 %v87_v26, %v84_v25 }
  0xae   :  { %89 = vst [vmem:[#allocation9] sm:$0xff] %v88_v27 }
  0xaf   :  { %173 = shalt.err (!%p170_p6)
}
  0xb0   :  { %s174_s22 = scalar_lea.hbm %s271_s3, 128 }
  0xb1   :  { %p175_p7 = scmp.ne.s32.totalorder %s271_s3, %s174_s22  ;;  %p178_p8 = scmp.lt.u32.totalorder %s174_s22, %s271_s3 }
  0xb3   :  { %p180_p9 = pnand %p178_p8, %p175_p7 }
  0xb5   :  { %183 = shalt.err (!%p180_p9)
}
  0xb6   :  { %99 = dma.vmem_to_hbm [thread:$0]  %s97_s18, 128, %s271_s3, [#allocation4]  }
  0xb7   :  { %190 = dma.done.wait [#allocation4], 128  }
  0xb8   :  { %191 = vsyncadd [#allocation4], 4294967168 }
  0xb9   :  { %103 = vsyncpa [#allocation3], 1 }
  0xba   :  { %104 = vsyncpa [#allocation4], 1 }
  0xbb   :  { %105 = vsyncpa [#allocation5], 1 }
  0xbc   :  { %106 = vsyncpa [#allocation6], 1 }

</bundles_post_ra>
